<compile_context>
chip_gen: v7x
topology: tpu7x:2x2x1
jax: 0.10.0
libtpu: 0.0.40
codegen_flags: <defaults>
</compile_context>

<pallas_src>
import numpy as np
import jax
import jax.numpy as jnp
from jax import lax
from jax.experimental import pallas as pl
from jax.experimental.pallas import tpu as pltpu

# ----- config (mirrors the `args` namespace of RISKRNNQRAgent) -----------------
INPUT_SHAPE = 32
RNN_HIDDEN_DIM = 64
N_ACTIONS = 4
N_QUANTILES = 8
N_TARGET_QUANTILES = 8
RISK_TYPE = "cvar"
RISK_PARAM = 0.5
SORT_QUANTILES = True
MASKED_OUT_QUANTILES = True
BATCH = 4
T_STEPS = 3                      # extra multi-step test (module forward == T=1)

assert N_QUANTILES == N_TARGET_QUANTILES, "logits.view(B, A, n_target_quantiles) requires equality"

H = RNN_HIDDEN_DIM
A = N_ACTIONS
Q = N_TARGET_QUANTILES
AQ = A * Q

OUTW = 128                       # lane-dense (full-vreg) padded quantile-head width
GW = 4 * H                       # packed gate width: r | z | n_x | n_h  (=256)
assert AQ <= OUTW and OUTW <= GW and H % 8 == 0 and INPUT_SHAPE % 8 == 0

# packed-weight row offsets
R_W1 = 0
R_GRU = ((INPUT_SHAPE + 7) // 8) * 8          # 32
R_GRU_H = R_GRU + H                           # 96
R_W2 = R_GRU_H + H                            # 160
W_ROWS = R_W2 + H                             # 224

# number of surviving (lowest) quantiles under the CVaR mask, static.
_CD = (2.0 * np.arange(Q) + 1.0) / (2.0 * Q)
KEEP = int(np.sum(_CD <= RISK_PARAM)) if (RISK_TYPE == "cvar" and MASKED_OUT_QUANTILES) else Q


# ----------------------------- kernel -------------------------------------------
def riskq_kernel(x_ref, h0_ref, w_ref, b_ref, q_ref, h_out_ref, xh_scr):
    t = pl.program_id(0)

    # step 0: load initial hidden state into the [x1 | h] carry scratch
    @pl.when(t == 0)
    def _init():
        xh_scr[:, H:2 * H] = h0_ref[...]

    x = x_ref[0]                                        # (BP, INPUT_SHAPE)
    bp = x.shape[0]

    # ---- fc1 + relu -----------------------------------------------------------
    w1 = w_ref[R_W1:R_W1 + INPUT_SHAPE, 0:H]
    x1 = jnp.dot(x, w1, preferred_element_type=jnp.float32) + b_ref[0:1, 0:H]
    x1 = jnp.maximum(x1, 0.0)

    # ---- GRUCell, fused into ONE (BP, 2H) x (2H, 4H) matmul --------------------
    # gate columns: [0:H]=r (x+h), [H:2H]=z (x+h), [2H:3H]=x-side n, [3H:4H]=h-side n
    xh_scr[:, 0:H] = x1
    xh = xh_scr[...]                                    # (BP, 2H) = [x1 | h_prev]
    h_prev = xh[:, H:2 * H]
    gates = (jnp.dot(xh, w_ref[R_GRU:R_GRU + 2 * H, :],
                     preferred_element_type=jnp.float32)
             + b_ref[1:2, :])                           # (BP, 4H)
    r = jax.nn.sigmoid(gates[:, 0:H])
    z = jax.nn.sigmoid(gates[:, H:2 * H])
    n = jnp.tanh(gates[:, 2 * H:3 * H] + r * gates[:, 3 * H:4 * H])
    h_new = (1.0 - z) * n + z * h_prev                  # (BP, H)

    xh_scr[:, H:2 * H] = h_new                          # carry for next step
    h_out_ref[...] = h_new

    # ---- fc2, padded to a lane-dense OUTW=128 head -----------------------------
    logits = (jnp.dot(h_new, w_ref[R_W2:R_W2 + H, 0:OUTW],
                      preferred_element_type=jnp.float32)
              + b_ref[2:3, 0:OUTW])                     # (BP, OUTW); lanes >= AQ are 0

    col = lax.broadcasted_iota(jnp.int32, (bp, OUTW), 1)
    valid = col < AQ
    qpos = col % Q                                      # local quantile index

    if SORT_QUANTILES:
        # -- roll-direction probe: makes the network correct whichever rotation
        #    convention pltpu.roll uses (np.roll-like or reversed).
        lane_f = col.astype(jnp.float32)
        probe = pltpu.roll(lane_f, 1, axis=1)
        expect = jnp.where(lane_f == 0.0, float(OUTW - 1), lane_f - 1.0)
        is_np_roll = probe == expect                    # uniformly True or False

        # -- compare-exchange masks for the odd-even transposition network
        not_bound = qpos != (Q - 1)
        parity = col % 2
        colm1 = col - 1
        hi_base = (col >= 1) & (colm1 < AQ) & ((colm1 % Q) != (Q - 1))
        lo_masks = []
        hi_masks = []
        for p in (0, 1):
            lo_masks.append(valid & (parity == p) & not_bound)
            hi_masks.append(hi_base & ((colm1 % 2) == p))

        xs = logits
        for step in range(Q + 2):                       # >= Q passes sorts each segment
            p = step % 2
            r1 = pltpu.roll(xs, 1, axis=1)
            r2 = pltpu.roll(xs, OUTW - 1, axis=1)
            left = jnp.where(is_np_roll, r1, r2)        # xs[i-1]
            right = jnp.where(is_np_roll, r2, r1)       # xs[i+1]
            xs = jnp.where(lo_masks[p], jnp.minimum(xs, right),
                           jnp.where(hi_masks[p], jnp.maximum(xs, left), xs))
    else:
        xs = logits

    # ---- CVaR mask (baked at compile time) + zero padding lanes ----------------
    if SORT_QUANTILES and MASKED_OUT_QUANTILES and RISK_TYPE == "cvar":
        keep = valid & (qpos < KEEP)
    else:
        keep = valid
    q_ref[0] = jnp.where(keep, xs, 0.0)


# ----------------------------- host-side wrappers --------------------------------
def _round_up(x, m):
    return ((x + m - 1) // m) * m


def pack_params(p):
    """Pack all module parameters into one weight slab and one bias slab."""
    W = np.zeros((W_ROWS, GW), np.float32)
    W[R_W1:R_W1 + INPUT_SHAPE, 0:H] = np.asarray(p["w1"])
    W[R_GRU:R_GRU + H, 0:H] = np.asarray(p["w_ir"])
    W[R_GRU:R_GRU + H, H:2 * H] = np.asarray(p["w_iz"])
    W[R_GRU:R_GRU + H, 2 * H:3 * H] = np.asarray(p["w_in"])
    W[R_GRU_H:R_GRU_H + H, 0:H] = np.asarray(p["w_hr"])
    W[R_GRU_H:R_GRU_H + H, H:2 * H] = np.asarray(p["w_hz"])
    W[R_GRU_H:R_GRU_H + H, 3 * H:4 * H] = np.asarray(p["w_hn"])
    W[R_W2:R_W2 + H, 0:AQ] = np.asarray(p["w2"])

    Bb = np.zeros((8, GW), np.float32)
    Bb[0, 0:H] = np.asarray(p["b1"])
    Bb[1, 0:H] = np.asarray(p["b_ir"]) + np.asarray(p["b_hr"])
    Bb[1, H:2 * H] = np.asarray(p["b_iz"]) + np.asarray(p["b_hz"])
    Bb[1, 2 * H:3 * H] = np.asarray(p["b_in"])
    Bb[1, 3 * H:4 * H] = np.asarray(p["b_hn"])
    Bb[2, 0:AQ] = np.asarray(p["b2"])
    return jnp.asarray(W), jnp.asarray(Bb)


def _riskq_forward_sequence(inputs_seq, hidden, w_packed, b_packed):
    """Run T recurrent steps inside one pallas_call.

    inputs_seq: (T, B, INPUT_SHAPE); hidden: (B, H)
    returns: q (T, B, A, Q), h_final (B, H)
    """
    T, B, _ = inputs_seq.shape
    BP = max(8, _round_up(B, 8))                         # sublane-dense batch

    x_p = jnp.zeros((T, BP, INPUT_SHAPE), jnp.float32).at[:, :B, :].set(inputs_seq)
    h_p = jnp.zeros((BP, H), jnp.float32).at[:B, :].set(hidden)

    flops = 2 * T * BP * (INPUT_SHAPE * H + (2 * H) * GW + H * OUTW)
    transcendentals = 3 * T * BP * H
    bytes_accessed = 4 * (W_ROWS * GW + 8 * GW + T * BP * INPUT_SHAPE
                          + BP * H + T * BP * OUTW + BP * H)

    grid_spec = pltpu.PrefetchScalarGridSpec(
        num_scalar_prefetch=0,
        grid=(T,),
        in_specs=[
            pl.BlockSpec((1, BP, INPUT_SHAPE), lambda t: (t, 0, 0)),
            pl.BlockSpec((BP, H), lambda t: (0, 0)),          # h0: resident
            pl.BlockSpec((W_ROWS, GW), lambda t: (0, 0)),     # packed weights: resident
            pl.BlockSpec((8, GW), lambda t: (0, 0)),          # packed biases: resident
        ],
        out_specs=[
            pl.BlockSpec((1, BP, OUTW), lambda t: (t, 0, 0)),  # lane-dense q head
            pl.BlockSpec((BP, H), lambda t: (0, 0)),           # final hidden
        ],
        scratch_shapes=[pltpu.VMEM((BP, 2 * H), jnp.float32)],  # [x1 | h] carry
    )

    q_pad, h_out = pl.pallas_call(
        riskq_kernel,
        out_shape=(jax.ShapeDtypeStruct((T, BP, OUTW), jnp.float32),
                   jax.ShapeDtypeStruct((BP, H), jnp.float32)),
        grid_spec=grid_spec,
        compiler_params=pltpu.CompilerParams(
            dimension_semantics=("arbitrary",)),   # recurrent axis stays sequential
        cost_estimate=pl.CostEstimate(flops=flops,
                                      transcendentals=transcendentals,
                                      bytes_accessed=bytes_accessed),
    )(x_p, h_p, w_packed, b_packed)

    q = q_pad[:, :B, :AQ].reshape(T, B, A, Q)
    return q, h_out[:B]


riskq_forward_sequence = jax.jit(_riskq_forward_sequence)


def riskq_forward(inputs, hidden, w_packed, b_packed):
    """Single step, exactly the module's forward(inputs, hidden_state)."""
    q, h = riskq_forward_sequence(inputs[None], hidden, w_packed, b_packed)
    return q[0], h


# ----------------------------- reference + test ----------------------------------
def make_params(key):
    ks = jax.random.split(key, 16)

    def u(k, shape, fan_in):
        s = 1.0 / np.sqrt(fan_in)
        return jax.random.uniform(k, shape, jnp.float32, -s, s)

    return dict(
        w1=u(ks[0], (INPUT_SHAPE, H), INPUT_SHAPE), b1=u(ks[1], (H,), INPUT_SHAPE),
        w_ir=u(ks[2], (H, H), H), w_iz=u(ks[3], (H, H), H), w_in=u(ks[4], (H, H), H),
        w_hr=u(ks[5], (H, H), H), w_hz=u(ks[6], (H, H), H), w_hn=u(ks[7], (H, H), H),
        b_ir=u(ks[8], (H,), H), b_iz=u(ks[9], (H,), H), b_in=u(ks[10], (H,), H),
        b_hr=u(ks[11], (H,), H), b_hz=u(ks[12], (H,), H), b_hn=u(ks[13], (H,), H),
        w2=u(ks[14], (H, AQ), H), b2=u(ks[15], (AQ,), H),
    )


def reference_step(x, h, p):
    """Pure-JAX mirror of RISKRNNQRAgent.forward (PyTorch GRUCell semantics)."""
    x1 = jnp.maximum(x @ p["w1"] + p["b1"], 0.0)
    r = jax.nn.sigmoid(x1 @ p["w_ir"] + p["b_ir"] + h @ p["w_hr"] + p["b_hr"])
    z = jax.nn.sigmoid(x1 @ p["w_iz"] + p["b_iz"] + h @ p["w_hz"] + p["b_hz"])
    n = jnp.tanh(x1 @ p["w_in"] + p["b_in"] + r * (h @ p["w_hn"] + p["b_hn"]))
    h_new = (1.0 - z) * n + z * h
    q = (h_new @ p["w2"] + p["b2"]).reshape(x.shape[0], A, Q)
    if SORT_QUANTILES:
        q = jnp.sort(q, axis=2)
        if MASKED_OUT_QUANTILES and RISK_TYPE == "cvar":
            cd = (2.0 * jnp.arange(Q, dtype=jnp.float32) + 1.0) / (2.0 * Q)
            q = q * (cd <= RISK_PARAM).astype(jnp.float32).reshape(1, 1, Q)
    return q, h_new


def reference_sequence(xs, h, p):
    qs = []
    for t in range(xs.shape[0]):
        q, h = reference_step(xs[t], h, p)
        qs.append(q)
    return jnp.stack(qs), h


if __name__ == "__main__":
    key = jax.random.PRNGKey(0)
    k_in, k_h, k_p = jax.random.split(key, 3)

    params = make_params(k_p)
    w_packed, b_packed = pack_params(params)

    inputs = jax.random.normal(k_in, (BATCH, INPUT_SHAPE), jnp.float32)
    hidden = jax.random.normal(k_h, (BATCH, H), jnp.float32)

    # --- single step: exact module semantics ---
    q1, h1 = riskq_forward(inputs, hidden, w_packed, b_packed)
    jax.block_until_ready((q1, h1))
    q1_ref, h1_ref = reference_step(inputs, hidden, params)
    np.testing.assert_allclose(np.asarray(q1), np.asarray(q1_ref), rtol=5e-4, atol=5e-4)
    np.testing.assert_allclose(np.asarray(h1), np.asarray(h1_ref), rtol=5e-4, atol=5e-4)

    # --- multi-step rollout: in-kernel recurrence, weights stay VMEM-resident ---
    xs = jax.random.normal(jax.random.PRNGKey(1), (T_STEPS, BATCH, INPUT_SHAPE), jnp.float32)
    qT, hT = riskq_forward_sequence(xs, hidden, w_packed, b_packed)
    jax.block_until_ready((qT, hT))
    qT_ref, hT_ref = reference_sequence(xs, hidden, params)
    np.testing.assert_allclose(np.asarray(qT), np.asarray(qT_ref), rtol=5e-4, atol=5e-4)
    np.testing.assert_allclose(np.asarray(hT), np.asarray(hT_ref), rtol=5e-4, atol=5e-4)

    print("KERNEL_OK")
</pallas_src>

<mosaic_0001>
module attributes {stable_mosaic.version = 11 : i64} {
  func.func @riskq_kernel(%arg0: i32, %arg1: memref<1x8x32xf32, #tpu.memory_space<vmem>>, %arg2: memref<8x64xf32, #tpu.memory_space<vmem>>, %arg3: memref<224x256xf32, #tpu.memory_space<vmem>>, %arg4: memref<8x256xf32, #tpu.memory_space<vmem>>, %arg5: memref<1x8x128xf32, #tpu.memory_space<vmem>>, %arg6: memref<8x64xf32, #tpu.memory_space<vmem>>, %arg7: memref<8x128xf32, #tpu.memory_space<vmem>>) attributes {dimension_semantics = [#tpu.dimension_semantics<arbitrary>], iteration_bounds = array<i64: 1>, scalar_prefetch = 0 : i64, scratch_operands = 1 : i64, tpu.core_type = #tpu.core_type<tc>, window_params = [{transform_indices = @transform_0, window_bounds = array<i64: 1, 8, 32>}, {pipeline_mode = #tpu.pipeline_mode<synchronous>, transform_indices = @transform_1, window_bounds = array<i64: 8, 64>}, {pipeline_mode = #tpu.pipeline_mode<synchronous>, transform_indices = @transform_2, window_bounds = array<i64: 224, 256>}, {pipeline_mode = #tpu.pipeline_mode<synchronous>, transform_indices = @transform_3, window_bounds = array<i64: 8, 256>}, {transform_indices = @transform_4, window_bounds = array<i64: 1, 8, 128>}, {pipeline_mode = #tpu.pipeline_mode<synchronous>, transform_indices = @transform_5, window_bounds = array<i64: 8, 64>}]} {
    %c0_i32 = arith.constant 0 : i32
    %0 = arith.cmpi eq, %arg0, %c0_i32 : i32
    %1 = arith.extui %0 : i1 to i32
    %c0_i32_0 = arith.constant 0 : i32
    %2 = arith.cmpi ne, %1, %c0_i32_0 : i32
    scf.if %2 {
      %c0_86 = arith.constant 0 : index
      %c0_87 = arith.constant 0 : index
      %255 = vector.load %arg2[%c0_86, %c0_87] : memref<8x64xf32, #tpu.memory_space<vmem>>, vector<8x64xf32>
      %c0_88 = arith.constant 0 : index
      %c64_89 = arith.constant 64 : index
      %256 = vector.load %arg7[%c0_88, %c64_89] : memref<8x128xf32, #tpu.memory_space<vmem>>, vector<8x64xf32>
      tpu.vector_store %arg7[%c0_88, %c64_89], %255 {strides = array<i32>} : memref<8x128xf32, #tpu.memory_space<vmem>>, vector<8x64xf32>,
    } else {
    }
    %c0 = arith.constant 0 : index
    %c0_1 = arith.constant 0 : index
    %c0_2 = arith.constant 0 : index
    %3 = vector.load %arg1[%c0, %c0_1, %c0_2] : memref<1x8x32xf32, #tpu.memory_space<vmem>>, vector<1x8x32xf32>
    %4 = vector.shape_cast %3 : vector<1x8x32xf32> to vector<8x32xf32>
    %c0_3 = arith.constant 0 : index
    %c0_4 = arith.constant 0 : index
    %5 = vector.load %arg3[%c0_3, %c0_4] : memref<224x256xf32, #tpu.memory_space<vmem>>, vector<32x64xf32>
    %cst = arith.constant dense<0.000000e+00> : vector<8x64xf32>
    %6 = tpu.matmul %4, %5, %cst {dimension_numbers = #tpu.dot_dimension_numbers<[1], [0], [0], [1], [0, 0, 1, 1], [], []>} : vector<8x32xf32>, vector<32x64xf32>, vector<8x64xf32> -> vector<8x64xf32>
    %c0_5 = arith.constant 0 : index
    %c0_6 = arith.constant 0 : index
    %7 = vector.load %arg4[%c0_5, %c0_6] : memref<8x256xf32, #tpu.memory_space<vmem>>, vector<1x64xf32>
    %8 = vector.broadcast %7 : vector<1x64xf32> to vector<8x64xf32>
    %9 = arith.addf %6, %8 : vector<8x64xf32>
    %cst_7 = arith.constant 0.000000e+00 : f32
    %10 = vector.broadcast %cst_7 : f32 to vector<8x64xf32>
    %11 = arith.maximumf %9, %10 : vector<8x64xf32>
    %c0_8 = arith.constant 0 : index
    %c0_9 = arith.constant 0 : index
    %12 = vector.load %arg7[%c0_8, %c0_9] : memref<8x128xf32, #tpu.memory_space<vmem>>, vector<8x64xf32>
    tpu.vector_store %arg7[%c0_8, %c0_9], %11 {strides = array<i32>} : memref<8x128xf32, #tpu.memory_space<vmem>>, vector<8x64xf32>,
    %c0_10 = arith.constant 0 : index
    %c0_11 = arith.constant 0 : index
    %13 = vector.load %arg7[%c0_10, %c0_11] : memref<8x128xf32, #tpu.memory_space<vmem>>, vector<8x128xf32>
    %14 = vector.extract_strided_slice %13 {offsets = [0, 64], sizes = [8, 64], strides = [1, 1]} : vector<8x128xf32> to vector<8x64xf32>
    %c32 = arith.constant 32 : index
    %c0_12 = arith.constant 0 : index
    %15 = vector.load %arg3[%c32, %c0_12] : memref<224x256xf32, #tpu.memory_space<vmem>>, vector<128x256xf32>
    %cst_13 = arith.constant dense<0.000000e+00> : vector<8x256xf32>
    %16 = tpu.matmul %13, %15, %cst_13 {dimension_numbers = #tpu.dot_dimension_numbers<[1], [0], [0], [1], [0, 0, 1, 1], [], []>} : vector<8x128xf32>, vector<128x256xf32>, vector<8x256xf32> -> vector<8x256xf32>
    %c1 = arith.constant 1 : index
    %c0_14 = arith.constant 0 : index
    %17 = vector.load %arg4[%c1, %c0_14] : memref<8x256xf32, #tpu.memory_space<vmem>>, vector<1x256xf32>
    %18 = vector.broadcast %17 : vector<1x256xf32> to vector<8x256xf32>
    %19 = arith.addf %16, %18 : vector<8x256xf32>
    %20 = vector.extract_strided_slice %19 {offsets = [0, 0], sizes = [8, 64], strides = [1, 1]} : vector<8x256xf32> to vector<8x64xf32>
    %21 = arith.negf %20 : vector<8x64xf32>
    %22 = math.exp %21 : vector<8x64xf32>
    %cst_15 = arith.constant 1.000000e+00 : f32
    %23 = vector.broadcast %cst_15 : f32 to vector<8x64xf32>
    %24 = arith.addf %23, %22 : vector<8x64xf32>
    %25 = arith.divf %23, %24 : vector<8x64xf32>
    %26 = vector.extract_strided_slice %19 {offsets = [0, 64], sizes = [8, 64], strides = [1, 1]} : vector<8x256xf32> to vector<8x64xf32>
    %27 = arith.negf %26 : vector<8x64xf32>
    %28 = math.exp %27 : vector<8x64xf32>
    %cst_16 = arith.constant 1.000000e+00 : f32
    %29 = vector.broadcast %cst_16 : f32 to vector<8x64xf32>
    %30 = arith.addf %29, %28 : vector<8x64xf32>
    %31 = arith.divf %29, %30 : vector<8x64xf32>
    %32 = vector.extract_strided_slice %19 {offsets = [0, 128], sizes = [8, 64], strides = [1, 1]} : vector<8x256xf32> to vector<8x64xf32>
    %33 = vector.extract_strided_slice %19 {offsets = [0, 192], sizes = [8, 64], strides = [1, 1]} : vector<8x256xf32> to vector<8x64xf32>
    %34 = arith.mulf %25, %33 : vector<8x64xf32>
    %35 = arith.addf %32, %34 : vector<8x64xf32>
    %36 = math.tanh %35 : vector<8x64xf32>
    %cst_17 = arith.constant 1.000000e+00 : f32
    %37 = vector.broadcast %cst_17 : f32 to vector<8x64xf32>
    %38 = arith.subf %37, %31 : vector<8x64xf32>
    %39 = arith.mulf %38, %36 : vector<8x64xf32>
    %40 = arith.mulf %31, %14 : vector<8x64xf32>
    %41 = arith.addf %39, %40 : vector<8x64xf32>
    %c0_18 = arith.constant 0 : index
    %c64 = arith.constant 64 : index
    %42 = vector.load %arg7[%c0_18, %c64] : memref<8x128xf32, #tpu.memory_space<vmem>>, vector<8x64xf32>
    tpu.vector_store %arg7[%c0_18, %c64], %41 {strides = array<i32>} : memref<8x128xf32, #tpu.memory_space<vmem>>, vector<8x64xf32>,
    %c0_19 = arith.constant 0 : index
    %c0_20 = arith.constant 0 : index
    %43 = vector.load %arg6[%c0_19, %c0_20] : memref<8x64xf32, #tpu.memory_space<vmem>>, vector<8x64xf32>
    tpu.vector_store %arg6[%c0_19, %c0_20], %41 {strides = array<i32>} : memref<8x64xf32, #tpu.memory_space<vmem>>, vector<8x64xf32>,
    %c160 = arith.constant 160 : index
    %c0_21 = arith.constant 0 : index
    %44 = vector.load %arg3[%c160, %c0_21] : memref<224x256xf32, #tpu.memory_space<vmem>>, vector<64x128xf32>
    %cst_22 = arith.constant dense<0.000000e+00> : vector<8x128xf32>
    %45 = tpu.matmul %41, %44, %cst_22 {dimension_numbers = #tpu.dot_dimension_numbers<[1], [0], [0], [1], [0, 0, 1, 1], [], []>} : vector<8x64xf32>, vector<64x128xf32>, vector<8x128xf32> -> vector<8x128xf32>
    %c2 = arith.constant 2 : index
    %c0_23 = arith.constant 0 : index
    %46 = vector.load %arg4[%c2, %c0_23] : memref<8x256xf32, #tpu.memory_space<vmem>>, vector<1x128xf32>
    %47 = vector.broadcast %46 : vector<1x128xf32> to vector<8x128xf32>
    %48 = arith.addf %45, %47 : vector<8x128xf32>
    %49 = tpu.iota {dimensions = array<i32: 1>} : vector<8x128xi32>
    %c32_i32 = arith.constant 32 : i32
    %50 = vector.broadcast %c32_i32 : i32 to vector<8x128xi32>
    %51 = arith.cmpi slt, %49, %50 : vector<8x128xi32>
    %c8_i32 = arith.constant 8 : i32
    %c0_i32_24 = arith.constant 0 : i32
    %52 = arith.cmpi eq, %c8_i32, %c0_i32_24 : i32
    %c1_i32 = arith.constant 1 : i32
    %53 = arith.select %52, %c1_i32, %c8_i32 : i32
    %54 = vector.broadcast %53 : i32 to vector<8x128xi32>
    %55 = arith.remsi %49, %54 : vector<8x128xi32>
    %c0_i32_25 = arith.constant 0 : i32
    %56 = vector.broadcast %c0_i32_25 : i32 to vector<8x128xi32>
    %57 = arith.cmpi ne, %55, %56 : vector<8x128xi32>
    %c0_i32_26 = arith.constant 0 : i32
    %58 = vector.broadcast %c0_i32_26 : i32 to vector<8x128xi32>
    %59 = arith.cmpi slt, %55, %58 : vector<8x128xi32>
    %c0_i32_27 = arith.constant 0 : i32
    %60 = arith.cmpi slt, %53, %c0_i32_27 : i32
    %61 = vector.broadcast %60 : i1 to vector<8x128xi1>
    %62 = vector.broadcast %61 : vector<8x128xi1> to vector<8x128xi1>
    %63 = arith.xori %59, %62 : vector<8x128xi1>
    %64 = arith.andi %63, %57 : vector<8x128xi1>
    %65 = vector.broadcast %53 : i32 to vector<8x128xi32>
    %66 = arith.addi %55, %65 : vector<8x128xi32>
    %67 = arith.select %64, %66, %55 : vector<8x128xi1>, vector<8x128xi32>
    %68 = arith.sitofp %49 : vector<8x128xi32> to vector<8x128xf32>
    %c1_i32_28 = arith.constant 1 : i32
    %69 = tpu.dynamic_rotate %68 by %c1_i32_28 dim 1 : vector<8x128xf32>, i32 -> vector<8x128xf32>
    %cst_29 = arith.constant 0.000000e+00 : f32
    %70 = vector.broadcast %cst_29 : f32 to vector<8x128xf32>
    %71 = arith.cmpf oeq, %68, %70 : vector<8x128xf32>
    %cst_30 = arith.constant 1.000000e+00 : f32
    %72 = vector.broadcast %cst_30 : f32 to vector<8x128xf32>
    %73 = arith.subf %68, %72 : vector<8x128xf32>
    %cst_31 = arith.constant 1.270000e+02 : f32
    %74 = vector.broadcast %cst_31 : f32 to vector<8x128xf32>
    %75 = arith.select %71, %74, %73 : vector<8x128xi1>, vector<8x128xf32>
    %76 = arith.cmpf oeq, %69, %75 : vector<8x128xf32>
    %c7_i32 = arith.constant 7 : i32
    %77 = vector.broadcast %c7_i32 : i32 to vector<8x128xi32>
    %78 = arith.cmpi ne, %67, %77 : vector<8x128xi32>
    %c2_i32 = arith.constant 2 : i32
    %c0_i32_32 = arith.constant 0 : i32
    %79 = arith.cmpi eq, %c2_i32, %c0_i32_32 : i32
    %c1_i32_33 = arith.constant 1 : i32
    %80 = arith.select %79, %c1_i32_33, %c2_i32 : i32
    %81 = vector.broadcast %80 : i32 to vector<8x128xi32>
    %82 = arith.remsi %49, %81 : vector<8x128xi32>
    %c0_i32_34 = arith.constant 0 : i32
    %83 = vector.broadcast %c0_i32_34 : i32 to vector<8x128xi32>
    %84 = arith.cmpi ne, %82, %83 : vector<8x128xi32>
    %c0_i32_35 = arith.constant 0 : i32
    %85 = vector.broadcast %c0_i32_35 : i32 to vector<8x128xi32>
    %86 = arith.cmpi slt, %82, %85 : vector<8x128xi32>
    %c0_i32_36 = arith.constant 0 : i32
    %87 = arith.cmpi slt, %80, %c0_i32_36 : i32
    %88 = vector.broadcast %87 : i1 to vector<8x128xi1>
    %89 = vector.broadcast %88 : vector<8x128xi1> to vector<8x128xi1>
    %90 = arith.xori %86, %89 : vector<8x128xi1>
    %91 = arith.andi %90, %84 : vector<8x128xi1>
    %92 = vector.broadcast %80 : i32 to vector<8x128xi32>
    %93 = arith.addi %82, %92 : vector<8x128xi32>
    %94 = arith.select %91, %93, %82 : vector<8x128xi1>, vector<8x128xi32>
    %c1_i32_37 = arith.constant 1 : i32
    %95 = vector.broadcast %c1_i32_37 : i32 to vector<8x128xi32>
    %96 = arith.subi %49, %95 : vector<8x128xi32>
    %c1_i32_38 = arith.constant 1 : i32
    %97 = vector.broadcast %c1_i32_38 : i32 to vector<8x128xi32>
    %98 = arith.cmpi sge, %49, %97 : vector<8x128xi32>
    %c32_i32_39 = arith.constant 32 : i32
    %99 = vector.broadcast %c32_i32_39 : i32 to vector<8x128xi32>
    %100 = arith.cmpi slt, %96, %99 : vector<8x128xi32>
    %101 = arith.andi %98, %100 : vector<8x128xi1>
    %c8_i32_40 = arith.constant 8 : i32
    %c0_i32_41 = arith.constant 0 : i32
    %102 = arith.cmpi eq, %c8_i32_40, %c0_i32_41 : i32
    %c1_i32_42 = arith.constant 1 : i32
    %103 = arith.select %102, %c1_i32_42, %c8_i32_40 : i32
    %104 = vector.broadcast %103 : i32 to vector<8x128xi32>
    %105 = arith.remsi %96, %104 : vector<8x128xi32>
    %c0_i32_43 = arith.constant 0 : i32
    %106 = vector.broadcast %c0_i32_43 : i32 to vector<8x128xi32>
    %107 = arith.cmpi ne, %105, %106 : vector<8x128xi32>
    %c0_i32_44 = arith.constant 0 : i32
    %108 = vector.broadcast %c0_i32_44 : i32 to vector<8x128xi32>
    %109 = arith.cmpi slt, %105, %108 : vector<8x128xi32>
    %c0_i32_45 = arith.constant 0 : i32
    %110 = arith.cmpi slt, %103, %c0_i32_45 : i32
    %111 = vector.broadcast %110 : i1 to vector<8x128xi1>
    %112 = vector.broadcast %111 : vector<8x128xi1> to vector<8x128xi1>
    %113 = arith.xori %109, %112 : vector<8x128xi1>
    %114 = arith.andi %113, %107 : vector<8x128xi1>
    %115 = vector.broadcast %103 : i32 to vector<8x128xi32>
    %116 = arith.addi %105, %115 : vector<8x128xi32>
    %117 = arith.select %114, %116, %105 : vector<8x128xi1>, vector<8x128xi32>
    %c7_i32_46 = arith.constant 7 : i32
    %118 = vector.broadcast %c7_i32_46 : i32 to vector<8x128xi32>
    %119 = arith.cmpi ne, %117, %118 : vector<8x128xi32>
    %120 = arith.andi %101, %119 : vector<8x128xi1>
    %c0_i32_47 = arith.constant 0 : i32
    %121 = vector.broadcast %c0_i32_47 : i32 to vector<8x128xi32>
    %122 = arith.cmpi eq, %94, %121 : vector<8x128xi32>
    %123 = arith.andi %51, %122 : vector<8x128xi1>
    %124 = arith.andi %123, %78 : vector<8x128xi1>
    %c2_i32_48 = arith.constant 2 : i32
    %c0_i32_49 = arith.constant 0 : i32
    %125 = arith.cmpi eq, %c2_i32_48, %c0_i32_49 : i32
    %c1_i32_50 = arith.constant 1 : i32
    %126 = arith.select %125, %c1_i32_50, %c2_i32_48 : i32
    %127 = vector.broadcast %126 : i32 to vector<8x128xi32>
    %128 = arith.remsi %96, %127 : vector<8x128xi32>
    %c0_i32_51 = arith.constant 0 : i32
    %129 = vector.broadcast %c0_i32_51 : i32 to vector<8x128xi32>
    %130 = arith.cmpi ne, %128, %129 : vector<8x128xi32>
    %c0_i32_52 = arith.constant 0 : i32
    %131 = vector.broadcast %c0_i32_52 : i32 to vector<8x128xi32>
    %132 = arith.cmpi slt, %128, %131 : vector<8x128xi32>
    %c0_i32_53 = arith.constant 0 : i32
    %133 = arith.cmpi slt, %126, %c0_i32_53 : i32
    %134 = vector.broadcast %133 : i1 to vector<8x128xi1>
    %135 = vector.broadcast %134 : vector<8x128xi1> to vector<8x128xi1>
    %136 = arith.xori %132, %135 : vector<8x128xi1>
    %137 = arith.andi %136, %130 : vector<8x128xi1>
    %138 = vector.broadcast %126 : i32 to vector<8x128xi32>
    %139 = arith.addi %128, %138 : vector<8x128xi32>
    %140 = arith.select %137, %139, %128 : vector<8x128xi1>, vector<8x128xi32>
    %c0_i32_54 = arith.constant 0 : i32
    %141 = vector.broadcast %c0_i32_54 : i32 to vector<8x128xi32>
    %142 = arith.cmpi eq, %140, %141 : vector<8x128xi32>
    %143 = arith.andi %120, %142 : vector<8x128xi1>
    %c1_i32_55 = arith.constant 1 : i32
    %144 = vector.broadcast %c1_i32_55 : i32 to vector<8x128xi32>
    %145 = arith.cmpi eq, %94, %144 : vector<8x128xi32>
    %146 = arith.andi %51, %145 : vector<8x128xi1>
    %147 = arith.andi %146, %78 : vector<8x128xi1>
    %c2_i32_56 = arith.constant 2 : i32
    %c0_i32_57 = arith.constant 0 : i32
    %148 = arith.cmpi eq, %c2_i32_56, %c0_i32_57 : i32
    %c1_i32_58 = arith.constant 1 : i32
    %149 = arith.select %148, %c1_i32_58, %c2_i32_56 : i32
    %150 = vector.broadcast %149 : i32 to vector<8x128xi32>
    %151 = arith.remsi %96, %150 : vector<8x128xi32>
    %c0_i32_59 = arith.constant 0 : i32
    %152 = vector.broadcast %c0_i32_59 : i32 to vector<8x128xi32>
    %153 = arith.cmpi ne, %151, %152 : vector<8x128xi32>
    %c0_i32_60 = arith.constant 0 : i32
    %154 = vector.broadcast %c0_i32_60 : i32 to vector<8x128xi32>
    %155 = arith.cmpi slt, %151, %154 : vector<8x128xi32>
    %c0_i32_61 = arith.constant 0 : i32
    %156 = arith.cmpi slt, %149, %c0_i32_61 : i32
    %157 = vector.broadcast %156 : i1 to vector<8x128xi1>
    %158 = vector.broadcast %157 : vector<8x128xi1> to vector<8x128xi1>
    %159 = arith.xori %155, %158 : vector<8x128xi1>
    %160 = arith.andi %159, %153 : vector<8x128xi1>
    %161 = vector.broadcast %149 : i32 to vector<8x128xi32>
    %162 = arith.addi %151, %161 : vector<8x128xi32>
    %163 = arith.select %160, %162, %151 : vector<8x128xi1>, vector<8x128xi32>
    %c1_i32_62 = arith.constant 1 : i32
    %164 = vector.broadcast %c1_i32_62 : i32 to vector<8x128xi32>
    %165 = arith.cmpi eq, %163, %164 : vector<8x128xi32>
    %166 = arith.andi %120, %165 : vector<8x128xi1>
    %c1_i32_63 = arith.constant 1 : i32
    %167 = tpu.dynamic_rotate %48 by %c1_i32_63 dim 1 : vector<8x128xf32>, i32 -> vector<8x128xf32>
    %c127_i32 = arith.constant 127 : i32
    %168 = tpu.dynamic_rotate %48 by %c127_i32 dim 1 : vector<8x128xf32>, i32 -> vector<8x128xf32>
    %169 = arith.select %76, %167, %168 : vector<8x128xi1>, vector<8x128xf32>
    %170 = arith.select %76, %168, %167 : vector<8x128xi1>, vector<8x128xf32>
    %171 = arith.minimumf %48, %170 : vector<8x128xf32>
    %172 = arith.maximumf %48, %169 : vector<8x128xf32>
    %173 = arith.select %143, %172, %48 : vector<8x128xi1>, vector<8x128xf32>
    %174 = arith.select %124, %171, %173 : vector<8x128xi1>, vector<8x128xf32>
    %c1_i32_64 = arith.constant 1 : i32
    %175 = tpu.dynamic_rotate %174 by %c1_i32_64 dim 1 : vector<8x128xf32>, i32 -> vector<8x128xf32>
    %c127_i32_65 = arith.constant 127 : i32
    %176 = tpu.dynamic_rotate %174 by %c127_i32_65 dim 1 : vector<8x128xf32>, i32 -> vector<8x128xf32>
    %177 = arith.select %76, %175, %176 : vector<8x128xi1>, vector<8x128xf32>
    %178 = arith.select %76, %176, %175 : vector<8x128xi1>, vector<8x128xf32>
    %179 = arith.minimumf %174, %178 : vector<8x128xf32>
    %180 = arith.maximumf %174, %177 : vector<8x128xf32>
    %181 = arith.select %166, %180, %174 : vector<8x128xi1>, vector<8x128xf32>
    %182 = arith.select %147, %179, %181 : vector<8x128xi1>, vector<8x128xf32>
    %c1_i32_66 = arith.constant 1 : i32
    %183 = tpu.dynamic_rotate %182 by %c1_i32_66 dim 1 : vector<8x128xf32>, i32 -> vector<8x128xf32>
    %c127_i32_67 = arith.constant 127 : i32
    %184 = tpu.dynamic_rotate %182 by %c127_i32_67 dim 1 : vector<8x128xf32>, i32 -> vector<8x128xf32>
    %185 = arith.select %76, %183, %184 : vector<8x128xi1>, vector<8x128xf32>
    %186 = arith.select %76, %184, %183 : vector<8x128xi1>, vector<8x128xf32>
    %187 = arith.minimumf %182, %186 : vector<8x128xf32>
    %188 = arith.maximumf %182, %185 : vector<8x128xf32>
    %189 = arith.select %143, %188, %182 : vector<8x128xi1>, vector<8x128xf32>
    %190 = arith.select %124, %187, %189 : vector<8x128xi1>, vector<8x128xf32>
    %c1_i32_68 = arith.constant 1 : i32
    %191 = tpu.dynamic_rotate %190 by %c1_i32_68 dim 1 : vector<8x128xf32>, i32 -> vector<8x128xf32>
    %c127_i32_69 = arith.constant 127 : i32
    %192 = tpu.dynamic_rotate %190 by %c127_i32_69 dim 1 : vector<8x128xf32>, i32 -> vector<8x128xf32>
    %193 = arith.select %76, %191, %192 : vector<8x128xi1>, vector<8x128xf32>
    %194 = arith.select %76, %192, %191 : vector<8x128xi1>, vector<8x128xf32>
    %195 = arith.minimumf %190, %194 : vector<8x128xf32>
    %196 = arith.maximumf %190, %193 : vector<8x128xf32>
    %197 = arith.select %166, %196, %190 : vector<8x128xi1>, vector<8x128xf32>
    %198 = arith.select %147, %195, %197 : vector<8x128xi1>, vector<8x128xf32>
    %c1_i32_70 = arith.constant 1 : i32
    %199 = tpu.dynamic_rotate %198 by %c1_i32_70 dim 1 : vector<8x128xf32>, i32 -> vector<8x128xf32>
    %c127_i32_71 = arith.constant 127 : i32
    %200 = tpu.dynamic_rotate %198 by %c127_i32_71 dim 1 : vector<8x128xf32>, i32 -> vector<8x128xf32>
    %201 = arith.select %76, %199, %200 : vector<8x128xi1>, vector<8x128xf32>
    %202 = arith.select %76, %200, %199 : vector<8x128xi1>, vector<8x128xf32>
    %203 = arith.minimumf %198, %202 : vector<8x128xf32>
    %204 = arith.maximumf %198, %201 : vector<8x128xf32>
    %205 = arith.select %143, %204, %198 : vector<8x128xi1>, vector<8x128xf32>
    %206 = arith.select %124, %203, %205 : vector<8x128xi1>, vector<8x128xf32>
    %c1_i32_72 = arith.constant 1 : i32
    %207 = tpu.dynamic_rotate %206 by %c1_i32_72 dim 1 : vector<8x128xf32>, i32 -> vector<8x128xf32>
    %c127_i32_73 = arith.constant 127 : i32
    %208 = tpu.dynamic_rotate %206 by %c127_i32_73 dim 1 : vector<8x128xf32>, i32 -> vector<8x128xf32>
    %209 = arith.select %76, %207, %208 : vector<8x128xi1>, vector<8x128xf32>
    %210 = arith.select %76, %208, %207 : vector<8x128xi1>, vector<8x128xf32>
    %211 = arith.minimumf %206, %210 : vector<8x128xf32>
    %212 = arith.maximumf %206, %209 : vector<8x128xf32>
    %213 = arith.select %166, %212, %206 : vector<8x128xi1>, vector<8x128xf32>
    %214 = arith.select %147, %211, %213 : vector<8x128xi1>, vector<8x128xf32>
    %c1_i32_74 = arith.constant 1 : i32
    %215 = tpu.dynamic_rotate %214 by %c1_i32_74 dim 1 : vector<8x128xf32>, i32 -> vector<8x128xf32>
    %c127_i32_75 = arith.constant 127 : i32
    %216 = tpu.dynamic_rotate %214 by %c127_i32_75 dim 1 : vector<8x128xf32>, i32 -> vector<8x128xf32>
    %217 = arith.select %76, %215, %216 : vector<8x128xi1>, vector<8x128xf32>
    %218 = arith.select %76, %216, %215 : vector<8x128xi1>, vector<8x128xf32>
    %219 = arith.minimumf %214, %218 : vector<8x128xf32>
    %220 = arith.maximumf %214, %217 : vector<8x128xf32>
    %221 = arith.select %143, %220, %214 : vector<8x128xi1>, vector<8x128xf32>
    %222 = arith.select %124, %219, %221 : vector<8x128xi1>, vector<8x128xf32>
    %c1_i32_76 = arith.constant 1 : i32
    %223 = tpu.dynamic_rotate %222 by %c1_i32_76 dim 1 : vector<8x128xf32>, i32 -> vector<8x128xf32>
    %c127_i32_77 = arith.constant 127 : i32
    %224 = tpu.dynamic_rotate %222 by %c127_i32_77 dim 1 : vector<8x128xf32>, i32 -> vector<8x128xf32>
    %225 = arith.select %76, %223, %224 : vector<8x128xi1>, vector<8x128xf32>
    %226 = arith.select %76, %224, %223 : vector<8x128xi1>, vector<8x128xf32>
    %227 = arith.minimumf %222, %226 : vector<8x128xf32>
    %228 = arith.maximumf %222, %225 : vector<8x128xf32>
    %229 = arith.select %166, %228, %222 : vector<8x128xi1>, vector<8x128xf32>
    %230 = arith.select %147, %227, %229 : vector<8x128xi1>, vector<8x128xf32>
    %c1_i32_78 = arith.constant 1 : i32
    %231 = tpu.dynamic_rotate %230 by %c1_i32_78 dim 1 : vector<8x128xf32>, i32 -> vector<8x128xf32>
    %c127_i32_79 = arith.constant 127 : i32
    %232 = tpu.dynamic_rotate %230 by %c127_i32_79 dim 1 : vector<8x128xf32>, i32 -> vector<8x128xf32>
    %233 = arith.select %76, %231, %232 : vector<8x128xi1>, vector<8x128xf32>
    %234 = arith.select %76, %232, %231 : vector<8x128xi1>, vector<8x128xf32>
    %235 = arith.minimumf %230, %234 : vector<8x128xf32>
    %236 = arith.maximumf %230, %233 : vector<8x128xf32>
    %237 = arith.select %143, %236, %230 : vector<8x128xi1>, vector<8x128xf32>
    %238 = arith.select %124, %235, %237 : vector<8x128xi1>, vector<8x128xf32>
    %c1_i32_80 = arith.constant 1 : i32
    %239 = tpu.dynamic_rotate %238 by %c1_i32_80 dim 1 : vector<8x128xf32>, i32 -> vector<8x128xf32>
    %c127_i32_81 = arith.constant 127 : i32
    %240 = tpu.dynamic_rotate %238 by %c127_i32_81 dim 1 : vector<8x128xf32>, i32 -> vector<8x128xf32>
    %241 = arith.select %76, %239, %240 : vector<8x128xi1>, vector<8x128xf32>
    %242 = arith.select %76, %240, %239 : vector<8x128xi1>, vector<8x128xf32>
    %243 = arith.minimumf %238, %242 : vector<8x128xf32>
    %244 = arith.maximumf %238, %241 : vector<8x128xf32>
    %245 = arith.select %166, %244, %238 : vector<8x128xi1>, vector<8x128xf32>
    %246 = arith.select %147, %243, %245 : vector<8x128xi1>, vector<8x128xf32>
    %c4_i32 = arith.constant 4 : i32
    %247 = vector.broadcast %c4_i32 : i32 to vector<8x128xi32>
    %248 = arith.cmpi slt, %67, %247 : vector<8x128xi32>
    %249 = arith.andi %51, %248 : vector<8x128xi1>
    %cst_82 = arith.constant 0.000000e+00 : f32
    %250 = vector.broadcast %cst_82 : f32 to vector<8x128xf32>
    %251 = arith.select %249, %246, %250 : vector<8x128xi1>, vector<8x128xf32>
    %c0_83 = arith.constant 0 : index
    %c0_84 = arith.constant 0 : index
    %c0_85 = arith.constant 0 : index
    %252 = vector.load %arg5[%c0_83, %c0_84, %c0_85] : memref<1x8x128xf32, #tpu.memory_space<vmem>>, vector<1x8x128xf32>
    %253 = vector.shape_cast %252 : vector<1x8x128xf32> to vector<8x128xf32>
    %254 = vector.shape_cast %251 : vector<8x128xf32> to vector<1x8x128xf32>
    tpu.vector_store %arg5[%c0_83, %c0_84, %c0_85], %254 {strides = array<i32>} : memref<1x8x128xf32, #tpu.memory_space<vmem>>, vector<1x8x128xf32>,
    return
  }
  func.func @transform_0(%arg0: i32) -> (i32, i32, i32) {
    %c0_i32 = arith.constant 0 : i32
    %c0_i32_0 = arith.constant 0 : i32
    %c0_i32_1 = arith.constant 0 : i32
    return %arg0, %c0_i32, %c0_i32_0 : i32, i32, i32
  }
  func.func @transform_1(%arg0: i32) -> (i32, i32) {
    %c0_i32 = arith.constant 0 : i32
    %c0_i32_0 = arith.constant 0 : i32
    %c0_i32_1 = arith.constant 0 : i32
    return %c0_i32, %c0_i32_0 : i32, i32
  }
  func.func @transform_2(%arg0: i32) -> (i32, i32) {
    %c0_i32 = arith.constant 0 : i32
    %c0_i32_0 = arith.constant 0 : i32
    %c0_i32_1 = arith.constant 0 : i32
    return %c0_i32, %c0_i32_0 : i32, i32
  }
  func.func @transform_3(%arg0: i32) -> (i32, i32) {
    %c0_i32 = arith.constant 0 : i32
    %c0_i32_0 = arith.constant 0 : i32
    %c0_i32_1 = arith.constant 0 : i32
    return %c0_i32, %c0_i32_0 : i32, i32
  }
  func.func @transform_4(%arg0: i32) -> (i32, i32, i32) {
    %c0_i32 = arith.constant 0 : i32
    %c0_i32_0 = arith.constant 0 : i32
    %c0_i32_1 = arith.constant 0 : i32
    return %arg0, %c0_i32, %c0_i32_0 : i32, i32, i32
  }
  func.func @transform_5(%arg0: i32) -> (i32, i32) {
    %c0_i32 = arith.constant 0 : i32
    %c0_i32_0 = arith.constant 0 : i32
    %c0_i32_1 = arith.constant 0 : i32
    return %c0_i32, %c0_i32_0 : i32, i32
  }
}

</mosaic_0001>

<bundles_post_ra>
// kernel: _riskq_forward_sequence.1
= control target key start
LH: loop header
LB: loop body
LE: loop exit
PB: predicated region body
PF: predicated region fallthrough
CT: control target
= control target key end

     0   :  { %11 = vsyncpa [#allocation4], 0  ;;  %s682_s18 = smov [#allocation3]   ;;  %s940_s0 = inlined_call_operand.vmem [shape: f32[1,8,32], index: 0, kind: input, shape index: {}]   ;;  %s941_s1 = inlined_call_operand.vmem [shape: f32[8,64], index: 1, kind: input, shape index: {}]   ;;  %s942_s2 = inlined_call_operand.hbm [shape: f32[224,256], index: 2, kind: input, shape index: {}]   ;;  %s943_s3 = inlined_call_operand.vmem [shape: f32[8,256], index: 3, kind: input, shape index: {}]   ;;  %s944_s4 = inlined_call_operand.vmem [shape: f32[1,8,128], index: 4, kind: output, shape index: {0}]   ;;  %s945_s5 = inlined_call_operand.vmem [shape: f32[8,64], index: 5, kind: output, shape index: {1}]  }
   0x1   :  { %s21_s19 = sshll.u32 %s682_s18, 4  ;;  %s658_s22 = scalar_lea.hbm %s942_s2, 7168  ;;  %s22_s19 = int_to_ptr.vmem [resolvable:$true] %s21_s19 }
   0x2   :  { %p659_p0 = scmp.ne.s32.totalorder %s942_s2, %s658_s22  ;;  %p662_p1 = scmp.lt.u32.totalorder %s658_s22, %s942_s2 }
   0x4   :  { %p664_p2 = pnand %p662_p1, %p659_p0 }
   0x6   :  { %667 = shalt.err (!%p664_p2)
}
   0x7   :  { %s668_s27 = scalar_lea.vmem %s22_s19, 7168  ;;  %p673_p4 = scmp.lt.s32.totalorder %s22_s19, %s22_s19 }
   0x8   :  { %p669_p3 = scmp.ne.s32.totalorder %s22_s19, %s668_s27  ;;  %p674_p5 = scmp.lt.s32.totalorder %s668_s27, %s668_s27 }
   0xa   :  { %p675_p6 = por %p674_p5, %p673_p4 }
   0xc   :  { %p676_p7 = pnand %p675_p6, %p669_p3 }
   0xe   :  { %679 = shalt.err (!%p676_p7)
}
   0xf   :  { %s683_s28 = smov 256   ;;  %s684_s29 = smov 16  }
  0x10   :  { %27 = dma.hbm_to_vmem [thread:$0]  %s942_s2, 7168, %s22_s19, [#allocation4], %s683_s28, %s683_s28, %s684_s29  }
  0x11   :  { %680 = dma.done.wait [#allocation4], 7168  }
  0x12   :  { %681 = vsyncadd [#allocation4], 4294960128  ;;  %v685_v0 = vmov 0.0|0.0   ;;  %vm686_vm0 = vmmov 0   ;;  %v687_v1 = vmov 0.0   ;;  %v45_v2 = vld [vmem:[#allocation3] sm:$0xff] }
  0x13   :  { %593 = vmatprep.subr.bf16.mxu0 %v685_v0  ;;  %571 = vmatprep.mubr.msk.f32.mxu0 %vm686_vm0, %v687_v1  ;;  %v46_v3 = vld [vmem:[#allocation3 + $0x10] sm:$0xff]  ;;  %v47_v4 = vld [vmem:[#allocation3 + $0x20] sm:$0xff]  ;;  %v37_v7 = vld [vmem:[%s941_s1] sm:$0xff]  ;;  %s688_s2 = smov 64   ;;  %vm50_vm1 = vcmask 261120   ;;  %vm42_vm2 = vcmask 1048064  }
  0x14   :  { %237 = vmatprep.mubr.f32.mxu1 %v687_v1  ;;  %v594_v5 = vpack.c.bf16 %v46_v3, %v45_v2  ;;  %v48_v6 = vld [vmem:[#allocation3 + $0x30] sm:$0xff]  ;;  %39 = vrot.lane.b32.xlu0 %v37_v7, %s688_s2  ;;  %v129_v8 = vld [vmem:[#allocation3 + $0x48] sm:$0xff]  ;;  %v131_v9 = vld [vmem:[#allocation3 + $0x58] sm:$0xff]  ;;  %vm125_vm3 = vcmask 523264   ;;  %v163_v2 = vlaneseq  ;;  %s689_s13 = smov 1   ;;  %s690_s18 = smov 127  }
  0x15   :  { %v128_v10 = vld [vmem:[#allocation3 + $0x40] sm:$0xff]  ;;  %v597_v11 = vpack.c.bf16 %v48_v6, %v47_v4  ;;  %v599_v12 = vpack.c.bf16 %v131_v9, %v129_v8  ;;  %v130_v13 = vld [vmem:[#allocation3 + $0x50] sm:$0xff]  ;;  %v133_v14 = vld [vmem:[#allocation3 + $0x68] sm:$0xff] }
  0x16   :  { %595 = vmatpush3.bf16.msra.mxu0 %v594_v5  ;;  %v135_v15 = vld [vmem:[#allocation3 + $0x78] sm:$0xff]  ;;  %v601_v16 = vpack.c.bf16 %v130_v13, %v128_v10  ;;  %v132_v18 = vld [vmem:[#allocation3 + $0x60] sm:$0xff]  ;;  %v134_v19 = vld [vmem:[#allocation3 + $0x70] sm:$0xff]  ;;  %v164_v3 = vshrl.u32 %v163_v2, 7 }
  0x17   :  { %596 = vmatprep.subr.bf16.mxu0 %v685_v0  ;;  %v603_v17 = vpack.c.bf16 %v135_v15, %v133_v14  ;;  %v137_v20 = vld [vmem:[#allocation3 + $0x88] sm:$0xff]  ;;  %600 = vmatprep.subr.bf16.mxu1 %v599_v12  ;;  %v139_v21 = vld [vmem:[#allocation3 + $0x98] sm:$0xff]  ;;  %v605_v22 = vpack.c.bf16 %v134_v19, %v132_v18  ;;  %v136_v25 = vld [vmem:[#allocation3 + $0x80] sm:$0xff] }
  0x18   :  { %602 = vmatpush1.bf16.msra.mxu1 %v601_v16  ;;  %v44_v23 = vld [vmem:[%s940_s0] sm:$0xff]  ;;  %v607_v24 = vpack.c.bf16 %v139_v21, %v137_v20  ;;  %v138_v26 = vld [vmem:[#allocation3 + $0x90] sm:$0xff]  ;;  %v141_v27 = vld [vmem:[#allocation3 + $0xa8] sm:$0xff]  ;;  %v169_v4 = vsub.s32 1, %v164_v3  ;;  %v165_v10 = vsub.s32 0, %v164_v3 }
  0x19   :  { %604 = vmatprep.subr.bf16.mxu1 %v603_v17  ;;  %v143_v28 = vld [vmem:[#allocation3 + $0xb8] sm:$0xff]  ;;  %v609_v29 = vpack.c.bf16 %v138_v26, %v136_v25  ;;  %v140_v31 = vld [vmem:[#allocation3 + $0xa0] sm:$0xff]  ;;  %v142_v32 = vld [vmem:[#allocation3 + $0xb0] sm:$0xff] }
  0x1a   :  { %598 = vmatpush3.bf16.msra.mxu0 %v597_v11  ;;  %v611_v30 = vpack.c.bf16 %v143_v28, %v141_v27  ;;  %v145_v33 = vld [vmem:[#allocation3 + $0xc8] sm:$0xff]  ;;  %v147_v34 = vld [vmem:[#allocation3 + $0xd8] sm:$0xff]  ;;  %v613_v35 = vpack.c.bf16 %v142_v32, %v140_v31  ;;  %v144_v37 = vld [vmem:[#allocation3 + $0xc0] sm:$0xff] }
  0x1b   :  { %631 = vmatprep.subr.bf16.mxu0 %v685_v0  ;;  %v615_v36 = vpack.c.bf16 %v147_v34, %v145_v33  ;;  %v146_v38 = vld [vmem:[#allocation3 + $0xd0] sm:$0xff]  ;;  %v149_v40 = vld [vmem:[#allocation3 + $0xe8] sm:$0xff]  ;;  %v151_v41 = vld [vmem:[#allocation3 + $0xf8] sm:$0xff]  ;;  %v758_v33 = vand.u32 127, %v163_v2 }
  0x1c   :  { %606 = vmatpush1.bf16.msra.mxu1 %v605_v22  ;;  %v617_v39 = vpack.c.bf16 %v146_v38, %v144_v37  ;;  %v619_v42 = vpack.c.bf16 %v151_v41, %v149_v40  ;;  %v148_v43 = vld [vmem:[#allocation3 + $0xe0] sm:$0xff]  ;;  %v150_v44 = vld [vmem:[#allocation3 + $0xf0] sm:$0xff]  ;;  %v153_v46 = vld [vmem:[#allocation3 + $0x108] sm:$0xff] }
  0x1d   :  { %572 = vmatmul.mubr.msk.f32.vlgmr.msra.gmra.mrb[0].mxu0 %vm50_vm1, %v44_v23  ;;  %608 = vmatprep.subr.bf16.mxu1 %v607_v24  ;;  %v621_v45 = vpack.c.bf16 %v150_v44, %v148_v43  ;;  %v155_v47 = vld [vmem:[#allocation3 + $0x118] sm:$0xff]  ;;  %v152_v49 = vld [vmem:[#allocation3 + $0x100] sm:$0xff]  ;;  %v154_v50 = vld [vmem:[#allocation3 + $0x110] sm:$0xff]  ;;  %v368_v34 = vcvt.s32.f32 %v758_v33  ;;  %v546_v44 = vadd.s32 4294967295, %v758_v33  ;;  %vm389_vm10 = vcmp.ge.s32.totalorder %v758_v33, 1 }
  0x1e   :  { %590 = vmatprep.mubr.msk.f32.mxu0 %vm686_vm0, %v687_v1  ;;  %v623_v48 = vpack.c.bf16 %v155_v47, %v153_v46  ;;  %v625_v51 = vpack.c.bf16 %v154_v50, %v152_v49  ;;  %v157_v52 = vld [vmem:[#allocation3 + $0x128] sm:$0xff]  ;;  %v159_v53 = vld [vmem:[#allocation3 + $0x138] sm:$0xff]  ;;  %v156_v54 = vld [vmem:[#allocation3 + $0x120] sm:$0xff]  ;;  %vm355_vm0 = vcmp.lt.s32.totalorder %v758_v33, 32 }
  0x1f   :  { %v627_v55 = vpack.c.bf16 %v159_v53, %v157_v52  ;;  %v158_v56 = vld [vmem:[#allocation3 + $0x130] sm:$0xff]  ;;  %v49_v59 = vld [vmem:[%s943_s3] ss:$0 sm:$0xff]  ;;  %v542_v5 = vld [vmem:[%s943_s3 + $0x1] ss:$8 sm:$0x3] }
  0x20   :  { %610 = vmatpush1.bf16.msra.mxu1 %v609_v29  ;;  %v629_v57 = vpack.c.bf16 %v158_v56, %v156_v54  ;;  %v170_v6 = vrot.slane %v542_v5, %v169_v4  ;;  %v166_v11 = vrot.slane %v542_v5, %v165_v10  ;;  %v272_v20 = vld [vmem:[#allocation3 + $0x140] sm:$0xff]  ;;  %v273_v21 = vld [vmem:[#allocation3 + $0x150] sm:$0xff]  ;;  %vm392_vm4 = vcmp.lt.s32.totalorder %v546_v44, 0 }
  0x21   :  { %612 = vmatprep.subr.bf16.mxu1 %v611_v30  ;;  %v274_v22 = vld [vmem:[#allocation3 + $0x160] sm:$0xff]  ;;  %v632_v23 = vpack.c.bf16 %v273_v21, %v272_v20  ;;  %v275_v24 = vld [vmem:[#allocation3 + $0x170] sm:$0xff]  ;;  %vm390_vm11 = vcmp.lt.s32.totalorder %v546_v44, 32  ;;  %v380_v56 = vand.u32 1, %v758_v33  ;;  %vm371_vm13 = vcmp.eq.f32.partialorder %v368_v34, 0.0 }
  0x22   :  { %v635_v25 = vpack.c.bf16 %v275_v24, %v274_v22  ;;  %v276_v26 = vld [vmem:[#allocation3 + $0x180] sm:$0xff]  ;;  %v277_v27 = vld [vmem:[#allocation3 + $0x190] sm:$0xff]  ;;  %vm777_vm14 = vmand %vm389_vm10, %vm390_vm11 }
  0x23   :  { %633 = vmatpush3.bf16.msra.mxu0 %v632_v23  ;;  %v638_v28 = vpack.c.bf16 %v277_v27, %v276_v26  ;;  %v278_v30 = vld [vmem:[#allocation3 + $0x1a0] sm:$0xff]  ;;  %v279_v31 = vld [vmem:[#allocation3 + $0x1b0] sm:$0xff]  ;;  %vm406_vm1 = vcmp.eq.s32.totalorder %v380_v56, 0 }
  0x24   :  { %614 = vmatpush1.bf16.msra.mxu1 %v613_v35  ;;  %634 = vmatprep.subr.bf16.mxu0 %v685_v0  ;;  %v641_v32 = vpack.c.bf16 %v279_v31, %v278_v30 }
  0x25   :  { %616 = vmatprep.subr.bf16.mxu1 %v615_v36 }
  0x27   :  { %636 = vmatpush3.bf16.msra.mxu0 %v635_v25 }
  0x28   :  { %618 = vmatpush1.bf16.msra.mxu1 %v617_v39  ;;  %637 = vmatprep.subr.bf16.mxu0 %v685_v0 }
  0x29   :  { %620 = vmatprep.subr.bf16.mxu1 %v619_v42 }
  0x2b   :  { %639 = vmatpush3.bf16.msra.mxu0 %v638_v28 }
  0x2c   :  { %622 = vmatpush1.bf16.msra.mxu1 %v621_v45  ;;  %640 = vmatprep.subr.bf16.mxu0 %v685_v0  ;;  %v280_v0 = vld [vmem:[%s943_s3 + $0x2] ss:$0 sm:$0xff]  ;;  %v393_v45 = vsub.s32 0, %v546_v44 }
  0x2d   :  { %624 = vmatprep.subr.bf16.mxu1 %v623_v48 }
  0x2e   :  { %v547_v46 = vmin.u32 %v546_v44, %v393_v45 }
  0x2f   :  { %642 = vmatpush3.bf16.msra.mxu0 %v641_v32 }
  0x30   :  { %626 = vmatpush1.bf16.msra.mxu1 %v625_v51  ;;  %v396_v47 = vand.u32 7, %v547_v46  ;;  %v413_v48 = vand.u32 1, %v547_v46 }
  0x31   :  { %628 = vmatprep.subr.bf16.mxu1 %v627_v55 }
  0x32   :  { %v397_v49 = vsub.s32 0, %v396_v47  ;;  %v414_v50 = vsub.s32 0, %v413_v48 }
  0x34   :  { %630 = vmatpush1.bf16.msra.mxu1 %v629_v57  ;;  %v398_v51 = vsel %vm392_vm4, %v397_v49, %v396_v47  ;;  %v415_v52 = vsel %vm392_vm4, %v414_v50, %v413_v48  ;;  %v545_v57 = vadd.f32 -1.0, %v368_v34 }
  0x35   :  { %vm399_vm5 = vcmp.ne.s32.totalorder %v398_v51, 0  ;;  %vm400_vm6 = vcmp.lt.s32.totalorder %v398_v51, 0  ;;  %v402_v53 = vadd.s32 8, %v398_v51  ;;  %vm416_vm8 = vcmp.ne.s32.totalorder %v415_v52, 0 }
  0x36   :  { %vm401_vm7 = vmand %vm400_vm6, %vm399_vm5  ;;  %vm417_vm9 = vcmp.lt.s32.totalorder %v415_v52, 0  ;;  %v419_v54 = vadd.s32 2, %v415_v52 }
  0x37   :  { %v403_v55 = vsel %vm401_vm7, %v402_v53, %v398_v51  ;;  %vm418_vm12 = vmand %vm417_vm9, %vm416_vm8  ;;  %vm423_vm9 = vcmp.eq.s32.totalorder %v380_v56, 1 }
  0x38   :  { %vm781_vm15 = vcmp.ne.s32.totalorder %v403_v55, 7  ;;  %vm407_vm5 = vmand %vm355_vm0, %vm406_vm1 }
  0x39   :  { %vm424_vm11 = vmand %vm355_vm0, %vm423_vm9 }
  0x86   :  { %v40_v58 = vpop.permute.xlu0 %39 }
  0x87   :  { %43 = vst.msk [vmem:[#allocation2] sm:$0xff] %vm42_vm2, %v40_v58 }
  0xf0   :  { %v120_v60 = vpop.f32.mrb[0].mxu0 }
  0xf1   :  { %v121_v61 = vadd.f32 %v120_v60, %v49_v59  ;;  %v573_v62 = vpop.f32.mrb[1].mxu0 }
  0xf2   :  { %v360_v62 = vand.u32 7, %v758_v33 }
  0xf3   :  { %v124_v63 = vmax.f32 %v121_v61, 0.0  ;;  %v420_v61 = vsel %vm418_vm12, %v419_v54, %v415_v52 }
  0xf4   :  { %vm793_vm4 = vcmp.ne.s32.totalorder %v360_v62, 7  ;;  %vm426_vm10 = vcmp.eq.s32.totalorder %v420_v61, 1 }
  0xf5   :  { %126 = vst.msk [vmem:[#allocation2] sm:$0xff] %vm125_vm3, %v124_v63  ;;  %v373_v63 = vsel %vm371_vm13, 127.0, %v545_v57  ;;  %vm818_vm8 = vmand %vm407_vm5, %vm793_vm4 }
  0xf6   :  { %vm845_vm13 = vmand %vm424_vm11, %vm793_vm4 }
  0xfc   :  { %v127_v1 = vld [vmem:[#allocation2] sm:$0xff] }
  0xfd   :  { %238 = vmatmul.mubr.f32.vlgmr.msra.gmra.mrb[0].mxu1 %v127_v1 }
 0x1d0   :  { %v239_v7 = vpop.f32.mrb[0].mxu1 }
 0x1d1   :  { %v241_v8 = vpop.f32.mrb[1].mxu1  ;;  %v240_v12 = vadd.f32 %v239_v7, %v166_v11 }
 0x1d2   :  { %v242_v9 = vadd.f32 %v241_v8, %v170_v6 }
 0x1d3   :  { %v543_v13 = vmul.f32 -1.442695, %v240_v12 }
 0x1d4   :  { %251 = vrot.lane.b32.xlu0 %v242_v9, %s688_s2 }
 0x1d5   :  { %652 = vpow2.f32 %v543_v13 }
 0x1d8   :  { %369 = vrot.lane.b32.xlu0 %v368_v34, %s689_s13 }
 0x1df   :  { %v653_v14 = vpop.eup %652 }
 0x1e0   :  { %v247_v15 = vadd.f32 1.0, %v653_v14 }
 0x1e2   :  { %654 = vrcp.f32 %v247_v15 }
 0x1ec   :  { %v655_v16 = vpop.eup %654 }
 0x1ed   :  { %v257_v35 = vsub.f32 1.0, %v655_v16  ;;  %v263_v37 = vmul.f32 %v655_v16, %v127_v1 }
 0x246   :  { %v252_v17 = vpop.permute.xlu0 %251 }
 0x247   :  { %v254_v18 = vmul.f32 %v655_v16, %v252_v17 }
 0x249   :  { %v255_v19 = vadd.f32 %v254_v18, %v242_v9 }
 0x24a   :  { %v370_v58 = vpop.permute.xlu0 %369 }
 0x24b   :  { %656 = vtanh.f32 %v255_v19  ;;  %vm799_vm6 = vcmp.eq.f32.partialorder %v370_v58, %v373_v63 }
 0x255   :  { %v657_v29 = vpop.eup %656 }
 0x256   :  { %259 = vrot.lane.b32.xlu1 %v657_v29, %s688_s2 }
 0x2c8   :  { %v260_v36 = vpop.permute.xlu1 %259 }
 0x2c9   :  { %v262_v38 = vmul.f32 %v260_v36, %v257_v35 }
 0x2cb   :  { %v264_v39 = vadd.f32 %v263_v37, %v262_v38 }
 0x2cd   :  { %266 = vst.msk [vmem:[#allocation2] sm:$0xff] %vm42_vm2, %v264_v39  ;;  %268 = vrot.lane.b32.xlu1 %v264_v39, %s688_s2  ;;  %vm405_vm2 = vmand %vm777_vm14, %vm781_vm15  ;;  %vm528_vm14 = vcmp.lt.s32.totalorder %v360_v62, 4 }
 0x2ce   :  { %vm835_vm12 = vmand %vm405_vm2, %vm426_vm10 }
 0x2cf   :  { %vm529_vm15 = vmand %vm355_vm0, %vm528_vm14 }
 0x33f   :  { %v269_v40 = vpop.permute.xlu1 %268 }
 0x340   :  { %271 = vst.msk [vmem:[%s945_s5] sm:$0xff] %vm125_vm3, %v269_v40  ;;  %591 = vmatmul.mubr.msk.f32.vlgmr.msra.gmra.mrb[2].mxu0 %vm125_vm3, %v269_v40  ;;  %vm421_vm3 = vcmp.eq.s32.totalorder %v420_v61, 0 }
 0x341   :  { %vm808_vm7 = vmand %vm405_vm2, %vm421_vm3 }
 0x413   :  { %v349_v41 = vpop.f32.mrb[2].mxu0 }
 0x414   :  { %v350_v42 = vadd.f32 %v349_v41, %v280_v0  ;;  %v592_v43 = vpop.f32.mrb[3].mxu0 }
 0x416   :  { %430 = vrot.lane.b32.xlu0 %v350_v42, %s690_s18  ;;  %428 = vrot.lane.b32.xlu1 %v350_v42, %s689_s13 }
 0x488   :  { %v431_v3 = vpop.permute.xlu0 %430  ;;  %v429_v4 = vpop.permute.xlu1 %428 }
 0x489   :  { %v432_v6 = vsel %vm799_vm6, %v429_v4, %v431_v3  ;;  %v433_v7 = vsel %vm799_vm6, %v431_v3, %v429_v4 }
 0x48a   :  { %v434_v8 = vmin.f32 %v350_v42, %v433_v7  ;;  %v435_v9 = vmax.f32 %v350_v42, %v432_v6 }
 0x48c   :  { %v436_v11 = vsel %vm808_vm7, %v435_v9, %v350_v42 }
 0x48d   :  { %v437_v12 = vsel %vm818_vm8, %v434_v8, %v436_v11 }
 0x48e   :  { %440 = vrot.lane.b32.xlu0 %v437_v12, %s690_s18  ;;  %438 = vrot.lane.b32.xlu1 %v437_v12, %s689_s13 }
 0x500   :  { %v441_v13 = vpop.permute.xlu0 %440  ;;  %v439_v14 = vpop.permute.xlu1 %438 }
 0x501   :  { %v442_v16 = vsel %vm799_vm6, %v439_v14, %v441_v13  ;;  %v443_v17 = vsel %vm799_vm6, %v441_v13, %v439_v14 }
 0x502   :  { %v444_v18 = vmin.f32 %v437_v12, %v443_v17  ;;  %v445_v19 = vmax.f32 %v437_v12, %v442_v16 }
 0x504   :  { %v446_v21 = vsel %vm835_vm12, %v445_v19, %v437_v12 }
 0x505   :  { %v447_v22 = vsel %vm845_vm13, %v444_v18, %v446_v21 }
 0x506   :  { %450 = vrot.lane.b32.xlu0 %v447_v22, %s690_s18  ;;  %448 = vrot.lane.b32.xlu1 %v447_v22, %s689_s13 }
 0x578   :  { %v451_v23 = vpop.permute.xlu0 %450  ;;  %v449_v24 = vpop.permute.xlu1 %448 }
 0x579   :  { %v452_v25 = vsel %vm799_vm6, %v449_v24, %v451_v23  ;;  %v453_v26 = vsel %vm799_vm6, %v451_v23, %v449_v24 }
 0x57a   :  { %v454_v27 = vmin.f32 %v447_v22, %v453_v26  ;;  %v455_v28 = vmax.f32 %v447_v22, %v452_v25 }
 0x57c   :  { %v456_v29 = vsel %vm808_vm7, %v455_v28, %v447_v22 }
 0x57d   :  { %v457_v30 = vsel %vm818_vm8, %v454_v27, %v456_v29 }
 0x57e   :  { %460 = vrot.lane.b32.xlu0 %v457_v30, %s690_s18  ;;  %458 = vrot.lane.b32.xlu1 %v457_v30, %s689_s13 }
 0x5f0   :  { %v461_v31 = vpop.permute.xlu0 %460  ;;  %v459_v32 = vpop.permute.xlu1 %458 }
 0x5f1   :  { %v462_v34 = vsel %vm799_vm6, %v459_v32, %v461_v31  ;;  %v463_v35 = vsel %vm799_vm6, %v461_v31, %v459_v32 }
 0x5f2   :  { %v464_v36 = vmin.f32 %v457_v30, %v463_v35  ;;  %v465_v37 = vmax.f32 %v457_v30, %v462_v34 }
 0x5f4   :  { %v466_v38 = vsel %vm835_vm12, %v465_v37, %v457_v30 }
 0x5f5   :  { %v467_v39 = vsel %vm845_vm13, %v464_v36, %v466_v38 }
 0x5f6   :  { %470 = vrot.lane.b32.xlu0 %v467_v39, %s690_s18  ;;  %468 = vrot.lane.b32.xlu1 %v467_v39, %s689_s13 }
 0x668   :  { %v471_v40 = vpop.permute.xlu0 %470  ;;  %v469_v0 = vpop.permute.xlu1 %468 }
 0x669   :  { %v472_v41 = vsel %vm799_vm6, %v469_v0, %v471_v40  ;;  %v473_v42 = vsel %vm799_vm6, %v471_v40, %v469_v0 }
 0x66a   :  { %v474_v43 = vmin.f32 %v467_v39, %v473_v42  ;;  %v475_v44 = vmax.f32 %v467_v39, %v472_v41 }
 0x66c   :  { %v476_v45 = vsel %vm808_vm7, %v475_v44, %v467_v39 }
 0x66d   :  { %v477_v46 = vsel %vm818_vm8, %v474_v43, %v476_v45 }
 0x66e   :  { %480 = vrot.lane.b32.xlu0 %v477_v46, %s690_s18  ;;  %478 = vrot.lane.b32.xlu1 %v477_v46, %s689_s13 }
 0x6e0   :  { %v481_v47 = vpop.permute.xlu0 %480  ;;  %v479_v48 = vpop.permute.xlu1 %478 }
 0x6e1   :  { %v482_v49 = vsel %vm799_vm6, %v479_v48, %v481_v47  ;;  %v483_v50 = vsel %vm799_vm6, %v481_v47, %v479_v48 }
 0x6e2   :  { %v484_v51 = vmin.f32 %v477_v46, %v483_v50  ;;  %v485_v52 = vmax.f32 %v477_v46, %v482_v49 }
 0x6e4   :  { %v486_v53 = vsel %vm835_vm12, %v485_v52, %v477_v46 }
 0x6e5   :  { %v487_v54 = vsel %vm845_vm13, %v484_v51, %v486_v53 }
 0x6e6   :  { %490 = vrot.lane.b32.xlu0 %v487_v54, %s690_s18  ;;  %488 = vrot.lane.b32.xlu1 %v487_v54, %s689_s13 }
 0x758   :  { %v491_v55 = vpop.permute.xlu0 %490  ;;  %v489_v56 = vpop.permute.xlu1 %488 }
 0x759   :  { %v492_v57 = vsel %vm799_vm6, %v489_v56, %v491_v55  ;;  %v493_v58 = vsel %vm799_vm6, %v491_v55, %v489_v56 }
 0x75a   :  { %v494_v59 = vmin.f32 %v487_v54, %v493_v58  ;;  %v495_v60 = vmax.f32 %v487_v54, %v492_v57 }
 0x75c   :  { %v496_v61 = vsel %vm808_vm7, %v495_v60, %v487_v54 }
 0x75d   :  { %v497_v63 = vsel %vm818_vm8, %v494_v59, %v496_v61 }
 0x75e   :  { %500 = vrot.lane.b32.xlu0 %v497_v63, %s690_s18  ;;  %498 = vrot.lane.b32.xlu1 %v497_v63, %s689_s13 }
 0x7d0   :  { %v501_v1 = vpop.permute.xlu0 %500  ;;  %v499_v3 = vpop.permute.xlu1 %498 }
 0x7d1   :  { %v502_v4 = vsel %vm799_vm6, %v499_v3, %v501_v1  ;;  %v503_v6 = vsel %vm799_vm6, %v501_v1, %v499_v3 }
 0x7d2   :  { %v504_v7 = vmin.f32 %v497_v63, %v503_v6  ;;  %v505_v8 = vmax.f32 %v497_v63, %v502_v4 }
 0x7d4   :  { %v506_v9 = vsel %vm835_vm12, %v505_v8, %v497_v63 }
 0x7d5   :  { %v507_v11 = vsel %vm845_vm13, %v504_v7, %v506_v9 }
 0x7d6   :  { %510 = vrot.lane.b32.xlu0 %v507_v11, %s690_s18  ;;  %508 = vrot.lane.b32.xlu1 %v507_v11, %s689_s13 }
 0x848   :  { %v511_v12 = vpop.permute.xlu0 %510  ;;  %v509_v13 = vpop.permute.xlu1 %508 }
 0x849   :  { %v512_v14 = vsel %vm799_vm6, %v509_v13, %v511_v12  ;;  %v513_v16 = vsel %vm799_vm6, %v511_v12, %v509_v13 }
 0x84a   :  { %v514_v17 = vmin.f32 %v507_v11, %v513_v16  ;;  %v515_v18 = vmax.f32 %v507_v11, %v512_v14 }
 0x84c   :  { %v516_v19 = vsel %vm808_vm7, %v515_v18, %v507_v11 }
 0x84d   :  { %v517_v21 = vsel %vm818_vm8, %v514_v17, %v516_v19 }
 0x84e   :  { %520 = vrot.lane.b32.xlu0 %v517_v21, %s690_s18  ;;  %518 = vrot.lane.b32.xlu1 %v517_v21, %s689_s13 }
 0x8c0   :  { %v521_v22 = vpop.permute.xlu0 %520  ;;  %v519_v23 = vpop.permute.xlu1 %518 }
 0x8c1   :  { %v522_v24 = vsel %vm799_vm6, %v519_v23, %v521_v22  ;;  %v523_v25 = vsel %vm799_vm6, %v521_v22, %v519_v23 }
 0x8c2   :  { %v524_v5 = vmin.f32 %v517_v21, %v523_v25  ;;  %v525_v26 = vmax.f32 %v517_v21, %v522_v24 }
 0x8c4   :  { %v526_v10 = vsel %vm835_vm12, %v525_v26, %v517_v21 }
 0x8c5   :  { %v527_v27 = vsel %vm845_vm13, %v524_v5, %v526_v10 }
 0x8c6   :  { %v530_v28 = vsel %vm529_vm15, %v527_v27, 0.0 }
 0x8c7   :  { %531 = vst [vmem:[%s944_s4] sm:$0xff] %v530_v28 }
 0x8c8   :  { %540 = vsyncpa [#allocation4], 1 }

</bundles_post_ra>
